<compile_context>
chip_gen: v6e
topology: v6e:2x2x1
jax: 0.10.0
libtpu: 0.0.40
codegen_flags: <defaults>
</compile_context>

<pallas_src>
import jax
import jax.numpy as jnp
from jax.experimental import pallas as pl
from jax.experimental.pallas import tpu as pltpu

IN_DIM = 784
H1 = 512
H2 = 128
OUT_DIM = 10
TILE_N = 512  # batch tile for large batches


def mlp_kernel(x_ref, w1_ref, b1_ref, w2_ref, b2_ref, w3_ref, b3_ref, o_ref):
    # Three MXU matmuls, bf16 operands, f32 accumulation; bias adds in f32 (VPU).
    x = x_ref[...].astype(jnp.bfloat16)              # cast in-kernel (no HBM pass)
    h1 = jnp.dot(x, w1_ref[...], preferred_element_type=jnp.float32) + b1_ref[...]
    h2 = jnp.dot(h1.astype(jnp.bfloat16), w2_ref[...],
                 preferred_element_type=jnp.float32) + b2_ref[...]
    o = jnp.dot(h2.astype(jnp.bfloat16), w3_ref[...],
                preferred_element_type=jnp.float32) + b3_ref[...]
    o_ref[...] = o.astype(o_ref.dtype)


@jax.jit
def convnet_forward(x, w1, b1, w2, b2, w3, b3):
    # x: any leading shape whose trailing dims flatten to 784 (e.g. (N,1,28,28)),
    # matching PyTorch's x.view(-1, 784). Weights stored as (in, out) so the
    # kernel computes x @ W + b (== x @ W_pt.T + b).
    x2d = x.reshape(-1, IN_DIM)          # f32, unpadded; kernel reads it directly
    n = x2d.shape[0]

    # Weights as bf16 (tiny, one-time), biases as f32 rows.
    w1b = w1.astype(jnp.bfloat16)
    w2b = w2.astype(jnp.bfloat16)
    w3b = w3.astype(jnp.bfloat16)
    b1r = b1.astype(jnp.float32).reshape(1, H1)
    b2r = b2.astype(jnp.float32).reshape(1, H2)
    b3r = b3.astype(jnp.float32).reshape(1, OUT_DIM)

    # Batch tile: TILE_N for big batches; shrink to next multiple of 8 for small
    # batches. Ragged last block is handled by Pallas (masked stores).
    tile_n = TILE_N if n >= TILE_N else max(8, ((n + 7) // 8) * 8)
    grid = (pl.cdiv(n, tile_n),)

    # Weights/biases use constant index_maps -> resident across the whole grid.
    full = lambda shape: pl.BlockSpec(shape, lambda i: (0, 0))

    out = pl.pallas_call(
        mlp_kernel,
        out_shape=jax.ShapeDtypeStruct((n, OUT_DIM), jnp.float32),
        grid_spec=pltpu.PrefetchScalarGridSpec(
            num_scalar_prefetch=0,
            grid=grid,
            in_specs=[
                pl.BlockSpec((tile_n, IN_DIM), lambda i: (i, 0)),  # x tile (f32)
                full((IN_DIM, H1)),    # w1
                full((1, H1)),         # b1
                full((H1, H2)),        # w2
                full((1, H2)),         # b2
                full((H2, OUT_DIM)),   # w3
                full((1, OUT_DIM)),    # b3
            ],
            out_specs=pl.BlockSpec((tile_n, OUT_DIM), lambda i: (i, 0)),
        ),
        compiler_params=pltpu.CompilerParams(
            dimension_semantics=("parallel",),  # batch axis shards across TCs (v7x)
        ),
    )(x2d, w1b, b1r, w2b, b2r, w3b, b3r)

    return out


def init_params(key):
    # Deterministic init mimicking PyTorch nn.Linear default:
    # U(-1/sqrt(fan_in), 1/sqrt(fan_in)). Stored as (in, out).
    def linear(key, fan_in, fan_out):
        kw, kb = jax.random.split(key)
        bound = 1.0 / (fan_in ** 0.5)
        w = jax.random.uniform(kw, (fan_in, fan_out), jnp.float32, -bound, bound)
        b = jax.random.uniform(kb, (fan_out,), jnp.float32, -bound, bound)
        return w, b

    k1, k2, k3 = jax.random.split(key, 3)
    w1, b1 = linear(k1, IN_DIM, H1)
    w2, b2 = linear(k2, H1, H2)
    w3, b3 = linear(k3, H2, OUT_DIM)
    return w1, b1, w2, b2, w3, b3


def reference_bf16(x, w1, b1, w2, b2, w3, b3):
    # Same numerics as the kernel: bf16 matmul operands, f32 accumulation.
    xr = x.reshape(-1, IN_DIM).astype(jnp.bfloat16)
    h1 = jnp.dot(xr, w1.astype(jnp.bfloat16),
                 preferred_element_type=jnp.float32) + b1
    h2 = jnp.dot(h1.astype(jnp.bfloat16), w2.astype(jnp.bfloat16),
                 preferred_element_type=jnp.float32) + b2
    return jnp.dot(h2.astype(jnp.bfloat16), w3.astype(jnp.bfloat16),
                   preferred_element_type=jnp.float32) + b3


def reference_f32(x, w1, b1, w2, b2, w3, b3):
    xr = x.reshape(-1, IN_DIM)
    return ((xr @ w1 + b1) @ w2 + b2) @ w3 + b3


if __name__ == "__main__":
    key = jax.random.PRNGKey(0)
    kx, kp = jax.random.split(key)
    params = init_params(kp)

    # Small MNIST-like batch: (N=2, C=1, H=28, W=28) -> flattened to (2, 784).
    x = jax.random.normal(kx, (2, 1, 28, 28), dtype=jnp.float32)
    out = jax.block_until_ready(convnet_forward(x, *params))
    assert out.shape == (2, OUT_DIM), out.shape
    assert jnp.allclose(out, reference_bf16(x, *params), atol=2e-3, rtol=2e-3), \
        "mismatch vs bf16 reference (small batch)"
    assert jnp.allclose(out, reference_f32(x, *params), atol=5e-2), \
        "mismatch vs f32 reference (small batch)"

    # Second check exercising the multi-tile + ragged-last-block path
    # (n=600 -> grid of 2 steps with tile_n=512).
    x2 = jax.random.normal(jax.random.PRNGKey(1), (600, 1, 28, 28), dtype=jnp.float32)
    out2 = jax.block_until_ready(convnet_forward(x2, *params))
    assert out2.shape == (600, OUT_DIM), out2.shape
    assert jnp.allclose(out2, reference_bf16(x2, *params), atol=2e-3, rtol=2e-3), \
        "mismatch vs bf16 reference (multi-tile)"
    assert jnp.allclose(out2, reference_f32(x2, *params), atol=5e-2), \
        "mismatch vs f32 reference (multi-tile)"

    print("KERNEL_OK")
</pallas_src>

<mosaic_0001>
module attributes {stable_mosaic.version = 11 : i64} {
  func.func @mlp_kernel(%arg0: i32, %arg1: memref<8x784xf32, #tpu.memory_space<vmem>>, %arg2: memref<784x512xbf16, #tpu.memory_space<vmem>>, %arg3: memref<1x512xf32, #tpu.memory_space<vmem>>, %arg4: memref<512x128xbf16, #tpu.memory_space<vmem>>, %arg5: memref<1x128xf32, #tpu.memory_space<vmem>>, %arg6: memref<128x10xbf16, #tpu.memory_space<vmem>>, %arg7: memref<1x10xf32, #tpu.memory_space<vmem>>, %arg8: memref<8x10xf32, #tpu.memory_space<vmem>>) attributes {dimension_semantics = [#tpu.dimension_semantics<parallel>], iteration_bounds = array<i64: 1>, scalar_prefetch = 0 : i64, scratch_operands = 0 : i64, tpu.core_type = #tpu.core_type<tc>, window_params = [{transform_indices = @transform_0, window_bounds = array<i64: 8, 784>}, {pipeline_mode = #tpu.pipeline_mode<synchronous>, transform_indices = @transform_1, window_bounds = array<i64: 784, 512>}, {pipeline_mode = #tpu.pipeline_mode<synchronous>, transform_indices = @transform_2, window_bounds = array<i64: 1, 512>}, {pipeline_mode = #tpu.pipeline_mode<synchronous>, transform_indices = @transform_3, window_bounds = array<i64: 512, 128>}, {pipeline_mode = #tpu.pipeline_mode<synchronous>, transform_indices = @transform_4, window_bounds = array<i64: 1, 128>}, {pipeline_mode = #tpu.pipeline_mode<synchronous>, transform_indices = @transform_5, window_bounds = array<i64: 128, 10>}, {pipeline_mode = #tpu.pipeline_mode<synchronous>, transform_indices = @transform_6, window_bounds = array<i64: 1, 10>}, {transform_indices = @transform_7, window_bounds = array<i64: 8, 10>}]} {
    %c0 = arith.constant 0 : index
    %c0_0 = arith.constant 0 : index
    %0 = vector.load %arg1[%c0, %c0_0] : memref<8x784xf32, #tpu.memory_space<vmem>>, vector<8x784xf32>
    %1 = arith.truncf %0 : vector<8x784xf32> to vector<8x784xbf16>
    %c0_1 = arith.constant 0 : index
    %c0_2 = arith.constant 0 : index
    %2 = vector.load %arg2[%c0_1, %c0_2] : memref<784x512xbf16, #tpu.memory_space<vmem>>, vector<784x512xbf16>
    %cst = arith.constant dense<0.000000e+00> : vector<8x512xf32>
    %3 = tpu.matmul %1, %2, %cst {dimension_numbers = #tpu.dot_dimension_numbers<[1], [0], [0], [1], [0, 0, 1, 1], [], []>} : vector<8x784xbf16>, vector<784x512xbf16>, vector<8x512xf32> -> vector<8x512xf32>
    %c0_3 = arith.constant 0 : index
    %c0_4 = arith.constant 0 : index
    %4 = vector.load %arg3[%c0_3, %c0_4] : memref<1x512xf32, #tpu.memory_space<vmem>>, vector<1x512xf32>
    %5 = vector.broadcast %4 : vector<1x512xf32> to vector<8x512xf32>
    %6 = arith.addf %3, %5 : vector<8x512xf32>
    %7 = arith.truncf %6 : vector<8x512xf32> to vector<8x512xbf16>
    %c0_5 = arith.constant 0 : index
    %c0_6 = arith.constant 0 : index
    %8 = vector.load %arg4[%c0_5, %c0_6] : memref<512x128xbf16, #tpu.memory_space<vmem>>, vector<512x128xbf16>
    %cst_7 = arith.constant dense<0.000000e+00> : vector<8x128xf32>
    %9 = tpu.matmul %7, %8, %cst_7 {dimension_numbers = #tpu.dot_dimension_numbers<[1], [0], [0], [1], [0, 0, 1, 1], [], []>} : vector<8x512xbf16>, vector<512x128xbf16>, vector<8x128xf32> -> vector<8x128xf32>
    %c0_8 = arith.constant 0 : index
    %c0_9 = arith.constant 0 : index
    %10 = vector.load %arg5[%c0_8, %c0_9] : memref<1x128xf32, #tpu.memory_space<vmem>>, vector<1x128xf32>
    %11 = vector.broadcast %10 : vector<1x128xf32> to vector<8x128xf32>
    %12 = arith.addf %9, %11 : vector<8x128xf32>
    %13 = arith.truncf %12 : vector<8x128xf32> to vector<8x128xbf16>
    %c0_10 = arith.constant 0 : index
    %c0_11 = arith.constant 0 : index
    %14 = vector.load %arg6[%c0_10, %c0_11] : memref<128x10xbf16, #tpu.memory_space<vmem>>, vector<128x10xbf16>
    %cst_12 = arith.constant dense<0.000000e+00> : vector<8x10xf32>
    %15 = tpu.matmul %13, %14, %cst_12 {dimension_numbers = #tpu.dot_dimension_numbers<[1], [0], [0], [1], [0, 0, 1, 1], [], []>} : vector<8x128xbf16>, vector<128x10xbf16>, vector<8x10xf32> -> vector<8x10xf32>
    %c0_13 = arith.constant 0 : index
    %c0_14 = arith.constant 0 : index
    %16 = vector.load %arg7[%c0_13, %c0_14] : memref<1x10xf32, #tpu.memory_space<vmem>>, vector<1x10xf32>
    %17 = vector.broadcast %16 : vector<1x10xf32> to vector<8x10xf32>
    %18 = arith.addf %15, %17 : vector<8x10xf32>
    %c0_15 = arith.constant 0 : index
    %c0_16 = arith.constant 0 : index
    %19 = vector.load %arg8[%c0_15, %c0_16] : memref<8x10xf32, #tpu.memory_space<vmem>>, vector<8x10xf32>
    tpu.vector_store %arg8[%c0_15, %c0_16], %18 {strides = array<i32>} : memref<8x10xf32, #tpu.memory_space<vmem>>, vector<8x10xf32>,
    return
  }
  func.func @transform_0(%arg0: i32) -> (i32, i32) {
    %c0_i32 = arith.constant 0 : i32
    %c0_i32_0 = arith.constant 0 : i32
    return %arg0, %c0_i32 : i32, i32
  }
  func.func @transform_1(%arg0: i32) -> (i32, i32) {
    %c0_i32 = arith.constant 0 : i32
    %c0_i32_0 = arith.constant 0 : i32
    %c0_i32_1 = arith.constant 0 : i32
    return %c0_i32, %c0_i32_0 : i32, i32
  }
  func.func @transform_2(%arg0: i32) -> (i32, i32) {
    %c0_i32 = arith.constant 0 : i32
    %c0_i32_0 = arith.constant 0 : i32
    %c0_i32_1 = arith.constant 0 : i32
    return %c0_i32, %c0_i32_0 : i32, i32
  }
  func.func @transform_3(%arg0: i32) -> (i32, i32) {
    %c0_i32 = arith.constant 0 : i32
    %c0_i32_0 = arith.constant 0 : i32
    %c0_i32_1 = arith.constant 0 : i32
    return %c0_i32, %c0_i32_0 : i32, i32
  }
  func.func @transform_4(%arg0: i32) -> (i32, i32) {
    %c0_i32 = arith.constant 0 : i32
    %c0_i32_0 = arith.constant 0 : i32
    %c0_i32_1 = arith.constant 0 : i32
    return %c0_i32, %c0_i32_0 : i32, i32
  }
  func.func @transform_5(%arg0: i32) -> (i32, i32) {
    %c0_i32 = arith.constant 0 : i32
    %c0_i32_0 = arith.constant 0 : i32
    %c0_i32_1 = arith.constant 0 : i32
    return %c0_i32, %c0_i32_0 : i32, i32
  }
  func.func @transform_6(%arg0: i32) -> (i32, i32) {
    %c0_i32 = arith.constant 0 : i32
    %c0_i32_0 = arith.constant 0 : i32
    %c0_i32_1 = arith.constant 0 : i32
    return %c0_i32, %c0_i32_0 : i32, i32
  }
  func.func @transform_7(%arg0: i32) -> (i32, i32) {
    %c0_i32 = arith.constant 0 : i32
    %c0_i32_0 = arith.constant 0 : i32
    return %arg0, %c0_i32 : i32, i32
  }
}

</mosaic_0001>

<bundles_post_ra>
// kernel: convnet_forward.1
= control target key start
LH: loop header
LB: loop body
LE: loop exit
PB: predicated region body
PF: predicated region fallthrough
CT: control target
= control target key end

     0   :  { %12 = vsyncpa [#allocation3], 0  ;;  %v2824_v38 = vmov 1983009808   ;;  %v51_v40 = vlaneseq  ;;  %vm1327_vm0 = vcmask 130048   ;;  %vm2827_vm1 = vmmov 0   ;;  %s3672_s0 = inlined_call_operand.vmem [shape: f32[2,784], index: 0, kind: input, shape index: {}]   ;;  %s3673_s1 = inlined_call_operand.vmem [shape: bf16[784,512], index: 1, kind: input, shape index: {}]   ;;  %s3674_s2 = inlined_call_operand.vmem [shape: f32[1,512], index: 2, kind: input, shape index: {}]   ;;  %s3675_s3 = inlined_call_operand.vmem [shape: bf16[512,128], index: 3, kind: input, shape index: {}]   ;;  %s3676_s4 = inlined_call_operand.vmem [shape: f32[1,128], index: 4, kind: input, shape index: {}]   ;;  %s3677_s5 = inlined_call_operand.vmem [shape: bf16[128,10], index: 5, kind: input, shape index: {}]   ;;  %s3678_s6 = inlined_call_operand.vmem [shape: f32[1,10], index: 6, kind: input, shape index: {}]   ;;  %s3679_s7 = inlined_call_operand.hbm [shape: f32[2,10], index: 7, kind: output, shape index: {}]  }
   0x1   :  { %v2456_v0 = vld [vmem:[%s3673_s1 + $0xe4] ss:$16 sps:$4 sm:$0xff]   ;;  %v2460_v2 = vld [vmem:[%s3673_s1 + $0xe0] ss:$16 sps:$4 sm:$0xff]   ;;  %v49_v39 = vunpack.c.l.s4 %v2824_v38  ;;  %v2554_v56 = vld [vmem:[%s3672_s0 + $0x1c] ss:$14 sps:$4 sm:$0xff]  }
   0x2   :  { %v2458_v1 = vld [vmem:[%s3673_s1 + $0x2e4] ss:$16 sps:$4 sm:$0xff]   ;;  %v2461_v3 = vld [vmem:[%s3673_s1 + $0x2e0] ss:$16 sps:$4 sm:$0xff]   ;;  %1331 = vmatprep.subr.bf16.mxu0 %v2456_v0  ;;  %v2997_v46 = vshrl.u32 %v51_v40, 7  ;;  %vm2118_vm2 = vcmask 80896  }
   0x3   :  { %v2462_v4 = vld [vmem:[%s3673_s1 + $0xc4] ss:$16 sps:$4 sm:$0xff]   ;;  %1372 = vmatprep.subr.bf16.mxu1 %v2458_v1  ;;  %1332 = vmatpush1.bf16.msra.mxu0 %v2460_v2  ;;  %v2466_v6 = vld [vmem:[%s3673_s1 + $0xc0] ss:$16 sps:$4 sm:$0xff]   ;;  %v50_v45 = vunpack.c.0.s8 %v49_v39  ;;  %v2579_v40 = vld [vmem:[%s3673_s1 + $0xcc] ss:$16 sps:$4 sm:$0xff]  }
   0x4   :  { %v2464_v5 = vld [vmem:[%s3673_s1 + $0x2c4] ss:$16 sps:$4 sm:$0xff]   ;;  %1373 = vmatpush1.bf16.msra.mxu1 %v2461_v3  ;;  %1333 = vmatprep.subr.bf16.mxu0 %v2462_v4  ;;  %v2467_v7 = vld [vmem:[%s3673_s1 + $0x2c0] ss:$16 sps:$4 sm:$0xff]  }
   0x5   :  { %1374 = vmatprep.subr.bf16.mxu1 %v2464_v5  ;;  %v2468_v8 = vld [vmem:[%s3673_s1 + $0xa4] ss:$16 sps:$4 sm:$0xff]   ;;  %v2472_v10 = vld [vmem:[%s3673_s1 + $0xa0] ss:$16 sps:$4 sm:$0xff]   ;;  %v3015_v52 = vsub.s32 %v50_v45, %v2997_v46  ;;  %v2583_v45 = vld [vmem:[%s3673_s1 + $0xa8] ss:$16 sps:$4 sm:$0xff]  }
   0x6   :  { %v2470_v9 = vld [vmem:[%s3673_s1 + $0x2a4] ss:$16 sps:$4 sm:$0xff]   ;;  %v2473_v11 = vld [vmem:[%s3673_s1 + $0x2a0] ss:$16 sps:$4 sm:$0xff]  }
   0x7   :  { %1334 = vmatpush1.bf16.msra.mxu0 %v2466_v6  ;;  %v2474_v12 = vld [vmem:[%s3673_s1 + $0x84] ss:$16 sps:$4 sm:$0xff]   ;;  %v2478_v14 = vld [vmem:[%s3673_s1 + $0x80] ss:$16 sps:$4 sm:$0xff]   ;;  %v68_v61 = vrot.slane %v2554_v56, %v3015_v52 }
   0x8   :  { %1375 = vmatpush1.bf16.msra.mxu1 %v2467_v7  ;;  %1335 = vmatprep.subr.bf16.mxu0 %v2468_v8  ;;  %v2476_v13 = vld [vmem:[%s3673_s1 + $0x284] ss:$16 sps:$4 sm:$0xff]   ;;  %v2479_v15 = vld [vmem:[%s3673_s1 + $0x280] ss:$16 sps:$4 sm:$0xff]  }
   0x9   :  { %1376 = vmatprep.subr.bf16.mxu1 %v2470_v9  ;;  %v2480_v16 = vld [vmem:[%s3673_s1 + $0x64] ss:$16 sps:$4 sm:$0xff]   ;;  %v2484_v18 = vld [vmem:[%s3673_s1 + $0x60] ss:$16 sps:$4 sm:$0xff]  }
   0xa   :  { %v2482_v17 = vld [vmem:[%s3673_s1 + $0x264] ss:$16 sps:$4 sm:$0xff]   ;;  %v2485_v19 = vld [vmem:[%s3673_s1 + $0x260] ss:$16 sps:$4 sm:$0xff]  }
   0xb   :  { %1336 = vmatpush1.bf16.msra.mxu0 %v2472_v10  ;;  %v2486_v20 = vld [vmem:[%s3673_s1 + $0x44] ss:$16 sps:$4 sm:$0xff]   ;;  %v2490_v22 = vld [vmem:[%s3673_s1 + $0x40] ss:$16 sps:$4 sm:$0xff]  }
   0xc   :  { %1377 = vmatpush1.bf16.msra.mxu1 %v2473_v11  ;;  %1337 = vmatprep.subr.bf16.mxu0 %v2474_v12  ;;  %v2488_v21 = vld [vmem:[%s3673_s1 + $0x244] ss:$16 sps:$4 sm:$0xff]   ;;  %v2491_v23 = vld [vmem:[%s3673_s1 + $0x240] ss:$16 sps:$4 sm:$0xff]  }
   0xd   :  { %1378 = vmatprep.subr.bf16.mxu1 %v2476_v13  ;;  %v2492_v24 = vld [vmem:[%s3673_s1 + $0x24] ss:$16 sps:$4 sm:$0xff]   ;;  %v2496_v26 = vld [vmem:[%s3673_s1 + $0x20] ss:$16 sps:$4 sm:$0xff]  }
   0xe   :  { %v2494_v25 = vld [vmem:[%s3673_s1 + $0x224] ss:$16 sps:$4 sm:$0xff]   ;;  %v2497_v27 = vld [vmem:[%s3673_s1 + $0x220] ss:$16 sps:$4 sm:$0xff]  }
   0xf   :  { %1338 = vmatpush1.bf16.msra.mxu0 %v2478_v14  ;;  %v2498_v28 = vld [vmem:[%s3673_s1 + $0x4] ss:$16 sps:$4 sm:$0xff]   ;;  %v2502_v30 = vld [vmem:[%s3673_s1] ss:$16 sps:$4 sm:$0xff]  }
  0x10   :  { %1379 = vmatpush1.bf16.msra.mxu1 %v2479_v15  ;;  %1339 = vmatprep.subr.bf16.mxu0 %v2480_v16  ;;  %v2500_v29 = vld [vmem:[%s3673_s1 + $0x204] ss:$16 sps:$4 sm:$0xff]   ;;  %v2503_v31 = vld [vmem:[%s3673_s1 + $0x200] ss:$16 sps:$4 sm:$0xff]  }
  0x11   :  { %1380 = vmatprep.subr.bf16.mxu1 %v2482_v17  ;;  %v2504_v32 = vld [vmem:[%s3673_s1 + $0x1e4] ss:$16 sps:$4 sm:$0xff]   ;;  %v2508_v34 = vld [vmem:[%s3673_s1 + $0x1e0] ss:$16 sps:$4 sm:$0xff]  }
  0x12   :  { %v2506_v33 = vld [vmem:[%s3673_s1 + $0x3e4] ss:$16 sps:$4 sm:$0xff]   ;;  %v2509_v35 = vld [vmem:[%s3673_s1 + $0x3e0] ss:$16 sps:$4 sm:$0xff]  }
  0x13   :  { %1340 = vmatpush1.bf16.msra.mxu0 %v2484_v18  ;;  %v2510_v36 = vld [vmem:[%s3673_s1 + $0x1c4] ss:$16 sps:$4 sm:$0xff]   ;;  %v2514_v41 = vld [vmem:[%s3673_s1 + $0x1c0] ss:$16 sps:$4 sm:$0xff]  }
  0x14   :  { %1381 = vmatpush1.bf16.msra.mxu1 %v2485_v19  ;;  %1341 = vmatprep.subr.bf16.mxu0 %v2486_v20  ;;  %v2512_v37 = vld [vmem:[%s3673_s1 + $0x3c4] ss:$16 sps:$4 sm:$0xff]   ;;  %v2515_v42 = vld [vmem:[%s3673_s1 + $0x3c0] ss:$16 sps:$4 sm:$0xff]  }
  0x15   :  { %1382 = vmatprep.subr.bf16.mxu1 %v2488_v21  ;;  %v2516_v43 = vld [vmem:[%s3673_s1 + $0x1a4] ss:$16 sps:$4 sm:$0xff]   ;;  %v2520_v47 = vld [vmem:[%s3673_s1 + $0x1a0] ss:$16 sps:$4 sm:$0xff]  }
  0x16   :  { %v2518_v44 = vld [vmem:[%s3673_s1 + $0x3a4] ss:$16 sps:$4 sm:$0xff]   ;;  %v2521_v48 = vld [vmem:[%s3673_s1 + $0x3a0] ss:$16 sps:$4 sm:$0xff]  }
  0x17   :  { %1342 = vmatpush1.bf16.msra.mxu0 %v2490_v22  ;;  %v2522_v49 = vld [vmem:[%s3673_s1 + $0x184] ss:$16 sps:$4 sm:$0xff]   ;;  %v2526_v51 = vld [vmem:[%s3673_s1 + $0x180] ss:$16 sps:$4 sm:$0xff]  }
  0x18   :  { %1383 = vmatpush1.bf16.msra.mxu1 %v2491_v23  ;;  %1343 = vmatprep.subr.bf16.mxu0 %v2492_v24  ;;  %v2524_v50 = vld [vmem:[%s3673_s1 + $0x384] ss:$16 sps:$4 sm:$0xff]   ;;  %v2527_v53 = vld [vmem:[%s3673_s1 + $0x380] ss:$16 sps:$4 sm:$0xff]  }
  0x19   :  { %1384 = vmatprep.subr.bf16.mxu1 %v2494_v25  ;;  %v2528_v54 = vld [vmem:[%s3673_s1 + $0x164] ss:$16 sps:$4 sm:$0xff]   ;;  %v2552_v55 = vld [vmem:[%s3672_s0] ss:$14 sps:$4 sm:$0xff]  }
  0x1a   :  { %v2556_v57 = vld [vmem:[%s3672_s0 + $0x4] ss:$14 sps:$4 sm:$0xff]   ;;  %v2557_v58 = vld [vmem:[%s3672_s0 + $0x20] ss:$14 sps:$4 sm:$0xff]   ;;  %v54_v60 = vrot.slane %v2552_v55, %v3015_v52  ;;  %v2595_v55 = vld [vmem:[%s3673_s1 + $0x68] ss:$16 sps:$4 sm:$0xff]  }
  0x1b   :  { %1344 = vmatpush1.bf16.msra.mxu0 %v2496_v26  ;;  %v2530_v59 = vld [vmem:[%s3673_s1 + $0x364] ss:$16 sps:$4 sm:$0xff]   ;;  %v61_v62 = vrot.slane %v2556_v57, %v3015_v52  ;;  %v75_v63 = vrot.slane %v2557_v58, %v3015_v52  ;;  %v2532_v0 = vld [vmem:[%s3673_s1 + $0x160] ss:$16 sps:$4 sm:$0xff]  }
  0x1c   :  { %1385 = vmatpush1.bf16.msra.mxu1 %v2497_v27  ;;  %1345 = vmatprep.subr.bf16.mxu0 %v2498_v28  ;;  %v77_v1 = vcombine.high %v54_v60, %v68_v61  ;;  %v2533_v2 = vld [vmem:[%s3673_s1 + $0x360] ss:$16 sps:$4 sm:$0xff]   ;;  %v2534_v3 = vld [vmem:[%s3673_s1 + $0x144] ss:$16 sps:$4 sm:$0xff]   ;;  %v76_v18 = vcombine.low %v54_v60, %v68_v61  ;;  %v2603_v60 = vld [vmem:[%s3673_s1 + $0x4c] ss:$16 sps:$4 sm:$0xff]  }
  0x1d   :  { %1386 = vmatprep.subr.bf16.mxu1 %v2500_v29  ;;  %v79_v4 = vcombine.high %v61_v62, %v75_v63  ;;  %v2536_v5 = vld [vmem:[%s3673_s1 + $0x344] ss:$16 sps:$4 sm:$0xff]   ;;  %v2538_v6 = vld [vmem:[%s3673_s1 + $0x140] ss:$16 sps:$4 sm:$0xff]   ;;  %v78_v20 = vcombine.low %v61_v62, %v75_v63 }
  0x1e   :  { %v3057_v7 = vpack.c.bf16 %v77_v1, %v77_v1  ;;  %v2539_v8 = vld [vmem:[%s3673_s1 + $0x340] ss:$16 sps:$4 sm:$0xff]   ;;  %v2540_v10 = vld [vmem:[%s3673_s1 + $0x124] ss:$16 sps:$4 sm:$0xff]   ;;  %v3102_v24 = vpack.c.bf16 %v76_v18, %v76_v18  ;;  %v2625_v18 = vld [vmem:[%s3673_s1 + $0x1c8] ss:$16 sps:$4 sm:$0xff]  }
  0x1f   :  { %1346 = vmatpush1.bf16.msra.mxu0 %v2502_v30  ;;  %v3062_v9 = vpack.c.bf16 %v79_v4, %v79_v4  ;;  %v2542_v11 = vld [vmem:[%s3673_s1 + $0x324] ss:$16 sps:$4 sm:$0xff]   ;;  %v2544_v12 = vld [vmem:[%s3673_s1 + $0x120] ss:$16 sps:$4 sm:$0xff]   ;;  %v3107_v26 = vpack.c.bf16 %v78_v20, %v78_v20  ;;  %v2633_v20 = vld [vmem:[%s3673_s1 + $0x1ac] ss:$16 sps:$4 sm:$0xff]  }
  0x20   :  { %1387 = vmatpush1.bf16.msra.mxu1 %v2503_v31  ;;  %1347 = vmatprep.subr.bf16.mxu0 %v2504_v32  ;;  %v2545_v13 = vld [vmem:[%s3673_s1 + $0x320] ss:$16 sps:$4 sm:$0xff]   ;;  %v2546_v14 = vld [vmem:[%s3673_s1 + $0x104] ss:$16 sps:$4 sm:$0xff]   ;;  %v2569_v31 = vld [vmem:[%s3673_s1 + $0xec] ss:$16 sps:$4 sm:$0xff]  }
  0x21   :  { %1388 = vmatprep.subr.bf16.mxu1 %v2506_v33  ;;  %1363 = vmatprep.mubr.bf16.mxu0 %v3057_v7  ;;  %v2548_v15 = vld [vmem:[%s3673_s1 + $0x304] ss:$16 sps:$4 sm:$0xff]   ;;  %v2550_v16 = vld [vmem:[%s3673_s1 + $0x100] ss:$16 sps:$4 sm:$0xff]  }
  0x22   :  { %1404 = vmatprep.mubr.bf16.mxu1 %v3062_v9  ;;  %v2551_v17 = vld [vmem:[%s3673_s1 + $0x300] ss:$16 sps:$4 sm:$0xff]   ;;  %v2573_v19 = vld [vmem:[%s3672_s0 + $0xc] ss:$14 sps:$4 sm:$0x33]  }
  0x23   :  { %1348 = vmatpush2.bf16.msra.mxu0 %v2508_v34  ;;  %v2575_v21 = vld [vmem:[%s3672_s0 + $0x28] ss:$14 sps:$4 sm:$0x33]   ;;  %v2558_v25 = vld [vmem:[%s3673_s1 + $0x4e0] ss:$16 sps:$4 sm:$0xff]   ;;  %v97_v28 = vrot.slane %v2573_v19, %v3015_v52 }
  0x24   :  { %1389 = vmatpush2.bf16.msra.mxu1 %v2509_v35  ;;  %1349 = vmatprep.subr.bf16.mxu0 %v2510_v36  ;;  %v2560_v22 = vld [vmem:[%s3673_s1 + $0x4e4] ss:$16 sps:$4 sm:$0xff]   ;;  %v2561_v27 = vld [vmem:[%s3673_s1 + $0x600] ss:$16 sps:$4 sm:$0xff]   ;;  %v111_v29 = vrot.slane %v2575_v21, %v3015_v52  ;;  %v2825_v35 = vmov 0  }
  0x25   :  { %1390 = vmatprep.subr.bf16.mxu1 %v2512_v37  ;;  %v2563_v23 = vld [vmem:[%s3673_s1 + $0x604] ss:$16 sps:$4 sm:$0xff]   ;;  %v2564_v32 = vld [vmem:[%s3673_s1 + $0x4c0] ss:$16 sps:$4 sm:$0xff]   ;;  %v2567_v36 = vld [vmem:[%s3673_s1 + $0xe8] ss:$16 sps:$4 sm:$0xff]  }
  0x26   :  { %v2566_v30 = vld [vmem:[%s3673_s1 + $0x4c4] ss:$16 sps:$4 sm:$0xff]   ;;  %v114_v33 = vcombine.low %v97_v28, %v111_v29  ;;  %v2570_v37 = vld [vmem:[%s3673_s1 + $0x4a0] ss:$16 sps:$4 sm:$0xff]   ;;  %v2637_v28 = vld [vmem:[%s3673_s1 + $0x188] ss:$16 sps:$4 sm:$0xff]  }
  0x27   :  { %1350 = vmatpush2.bf16.msra.mxu0 %v2514_v41  ;;  %v2572_v34 = vld [vmem:[%s3673_s1 + $0x4a4] ss:$16 sps:$4 sm:$0xff]   ;;  %v2577_v41 = vld [vmem:[%s3673_s1 + $0xc8] ss:$16 sps:$4 sm:$0xff]   ;;  %v2598_v56 = vld [vmem:[%s3673_s1 + $0x420] ss:$16 sps:$4 sm:$0xff]  }
  0x28   :  { %1391 = vmatpush2.bf16.msra.mxu1 %v2515_v42  ;;  %1351 = vmatprep.subr.bf16.mxu0 %v2516_v43  ;;  %v3135_v38 = vpack.c.bf16 %v114_v33, %v114_v33  ;;  %v2582_v39 = vld [vmem:[%s3673_s1 + $0x484] ss:$16 sps:$4 sm:$0xff]   ;;  %v2580_v42 = vld [vmem:[%s3673_s1 + $0x480] ss:$16 sps:$4 sm:$0xff]  }
  0x29   :  { %1392 = vmatprep.subr.bf16.mxu1 %v2518_v44  ;;  %v2588_v43 = vld [vmem:[%s3673_s1 + $0x464] ss:$16 sps:$4 sm:$0xff]   ;;  %v2585_v44 = vld [vmem:[%s3673_s1 + $0xac] ss:$16 sps:$4 sm:$0xff]   ;;  %v2604_v63 = vld [vmem:[%s3673_s1 + $0x400] ss:$16 sps:$4 sm:$0xff]  }
  0x2a   :  { %v2606_v57 = vld [vmem:[%s3673_s1 + $0x404] ss:$16 sps:$4 sm:$0xff]   ;;  %v2610_v4 = vld [vmem:[%s3673_s1 + $0x5e0] ss:$16 sps:$4 sm:$0xff]  }
  0x2b   :  { %1352 = vmatpush2.bf16.msra.mxu0 %v2520_v47  ;;  %v2586_v47 = vld [vmem:[%s3673_s1 + $0x460] ss:$16 sps:$4 sm:$0xff]   ;;  %v2655_v58 = vld [vmem:[%s3672_s0 + $0x8] ss:$14 sps:$4 sm:$0xff]  }
  0x2c   :  { %1393 = vmatpush2.bf16.msra.mxu1 %v2521_v48  ;;  %1353 = vmatprep.subr.bf16.mxu0 %v2522_v49  ;;  %v2594_v48 = vld [vmem:[%s3673_s1 + $0x444] ss:$16 sps:$4 sm:$0xff]   ;;  %v2591_v49 = vld [vmem:[%s3673_s1 + $0x8c] ss:$16 sps:$4 sm:$0xff]   ;;  %v3201_v61 = vrot.slane %v2655_v58, %v3015_v52  ;;  %v2634_v21 = vld [vmem:[%s3673_s1 + $0x560] ss:$16 sps:$4 sm:$0xff]  }
  0x2d   :  { %1394 = vmatprep.subr.bf16.mxu1 %v2524_v50  ;;  %v2589_v50 = vld [vmem:[%s3673_s1 + $0x88] ss:$16 sps:$4 sm:$0xff]   ;;  %v2612_v1 = vld [vmem:[%s3673_s1 + $0x5e4] ss:$16 sps:$4 sm:$0xff]   ;;  %v2686_v58 = vld [vmem:[%s3673_s1 + $0x26c] ss:$16 sps:$4 sm:$0xff]  }
  0x2e   :  { %v2636_v19 = vld [vmem:[%s3673_s1 + $0x564] ss:$16 sps:$4 sm:$0xff]  }
  0x2f   :  { %1354 = vmatpush2.bf16.msra.mxu0 %v2526_v51  ;;  %v2592_v51 = vld [vmem:[%s3673_s1 + $0x440] ss:$16 sps:$4 sm:$0xff]   ;;  %v2648_v29 = vld [vmem:[%s3673_s1 + $0x524] ss:$16 sps:$4 sm:$0xff]  }
  0x30   :  { %1395 = vmatpush2.bf16.msra.mxu1 %v2527_v53  ;;  %1355 = vmatprep.subr.bf16.mxu0 %v2528_v54  ;;  %v2600_v53 = vld [vmem:[%s3673_s1 + $0x424] ss:$16 sps:$4 sm:$0xff]   ;;  %v2597_v54 = vld [vmem:[%s3673_s1 + $0x6c] ss:$16 sps:$4 sm:$0xff]  }
  0x31   :  { %1396 = vmatprep.subr.bf16.mxu1 %v2530_v59  ;;  %v2656_v59 = vld [vmem:[%s3672_s0 + $0x24] ss:$14 sps:$4 sm:$0xff]  }
  0x32   :  { %v3204_v62 = vrot.slane %v2656_v59, %v3015_v52  ;;  %v2609_v52 = vld [vmem:[%s3673_s1 + $0x2c] ss:$16 sps:$4 sm:$0xff]   ;;  %v2654_v33 = vld [vmem:[%s3673_s1 + $0x504] ss:$16 sps:$4 sm:$0xff]  }
  0x33   :  { %1356 = vmatpush2.bf16.msra.mxu0 %v2532_v0  ;;  %v2601_v0 = vld [vmem:[%s3673_s1 + $0x48] ss:$16 sps:$4 sm:$0xff]   ;;  %v2683_v59 = vld [vmem:[%s3673_s1 + $0x4ac] ss:$16 sps:$4 sm:$0xff]  }
  0x34   :  { %1397 = vmatpush2.bf16.msra.mxu1 %v2533_v2  ;;  %1357 = vmatprep.subr.bf16.mxu0 %v2534_v3  ;;  %v113_v2 = vcombine.high %v3201_v61, %v3204_v62 }
  0x35   :  { %1398 = vmatprep.subr.bf16.mxu1 %v2536_v5  ;;  %v2607_v5 = vld [vmem:[%s3673_s1 + $0x28] ss:$16 sps:$4 sm:$0xff]  }
  0x36   :  { %v3220_v3 = vpack.c.bf16 %v113_v2, %v113_v2  ;;  %v2698_v2 = vld [vmem:[%s3673_s1 + $0x22c] ss:$16 sps:$4 sm:$0xff]  }
  0x37   :  { %1358 = vmatpush2.bf16.msra.mxu0 %v2538_v6  ;;  %v2618_v6 = vld [vmem:[%s3673_s1 + $0x5c4] ss:$16 sps:$4 sm:$0xff]  }
  0x38   :  { %1399 = vmatpush2.bf16.msra.mxu1 %v2539_v8  ;;  %1359 = vmatprep.subr.bf16.mxu0 %v2540_v10  ;;  %v2616_v8 = vld [vmem:[%s3673_s1 + $0x5c0] ss:$16 sps:$4 sm:$0xff]   ;;  %v2613_v10 = vld [vmem:[%s3673_s1 + $0x8] ss:$16 sps:$4 sm:$0xff]  }
  0x39   :  { %1400 = vmatprep.subr.bf16.mxu1 %v2542_v11  ;;  %v2624_v11 = vld [vmem:[%s3673_s1 + $0x5a4] ss:$16 sps:$4 sm:$0xff]  }
  0x3b   :  { %1360 = vmatpush2.bf16.msra.mxu0 %v2544_v12  ;;  %v2621_v12 = vld [vmem:[%s3673_s1 + $0x1ec] ss:$16 sps:$4 sm:$0xff]  }
  0x3c   :  { %1401 = vmatpush2.bf16.msra.mxu1 %v2545_v13  ;;  %1361 = vmatprep.subr.bf16.mxu0 %v2546_v14  ;;  %v2622_v13 = vld [vmem:[%s3673_s1 + $0x5a0] ss:$16 sps:$4 sm:$0xff]   ;;  %v2619_v14 = vld [vmem:[%s3673_s1 + $0x1e8] ss:$16 sps:$4 sm:$0xff]  }
  0x3d   :  { %1402 = vmatprep.subr.bf16.mxu1 %v2548_v15  ;;  %v2630_v15 = vld [vmem:[%s3673_s1 + $0x584] ss:$16 sps:$4 sm:$0xff]  }
  0x3f   :  { %1362 = vmatpush2.bf16.msra.mxu0 %v2550_v16  ;;  %v2627_v16 = vld [vmem:[%s3673_s1 + $0x1cc] ss:$16 sps:$4 sm:$0xff]  }
  0x40   :  { %1403 = vmatpush2.bf16.msra.mxu1 %v2551_v17  ;;  %1413 = vmatprep.subr.bf16.mxu0 %v2560_v22  ;;  %v2628_v17 = vld [vmem:[%s3673_s1 + $0x580] ss:$16 sps:$4 sm:$0xff]   ;;  %v2631_v22 = vld [vmem:[%s3673_s1 + $0x1a8] ss:$16 sps:$4 sm:$0xff]  }
  0x41   :  { %1468 = vmatprep.subr.bf16.mxu1 %v2563_v23  ;;  %v2642_v23 = vld [vmem:[%s3673_s1 + $0x544] ss:$16 sps:$4 sm:$0xff]  }
  0x42   :  { %1364 = vmatmul.mubr.bf16.vlgmr.msra.gmra.mxu0 %v3102_v24 }
  0x43   :  { %1405 = vmatmul.mubr.bf16.vlgmr.msra.gmra.mxu1 %v3107_v26  ;;  %1414 = vmatpush1.bf16.msra.mxu0 %v2558_v25  ;;  %v2639_v25 = vld [vmem:[%s3673_s1 + $0x18c] ss:$16 sps:$4 sm:$0xff]  }
  0x44   :  { %1469 = vmatpush1.bf16.msra.mxu1 %v2561_v27  ;;  %1415 = vmatprep.subr.bf16.mxu0 %v2566_v30  ;;  %v2640_v27 = vld [vmem:[%s3673_s1 + $0x540] ss:$16 sps:$4 sm:$0xff]   ;;  %v2645_v30 = vld [vmem:[%s3673_s1 + $0x16c] ss:$16 sps:$4 sm:$0xff]  }
  0x45   :  { %1486 = vmatprep.mubr.bf16.mxu1 %v2825_v35  ;;  %1495 = vmatprep.subr.bf16.mxu1 %v2569_v31  ;;  %v2646_v31 = vld [vmem:[%s3673_s1 + $0x520] ss:$16 sps:$4 sm:$0xff]  }
  0x46   :  { %1445 = vmatprep.mubr.bf16.mxu0 %v3220_v3 }
  0x47   :  { %1416 = vmatpush1.bf16.msra.mxu0 %v2564_v32  ;;  %v2643_v32 = vld [vmem:[%s3673_s1 + $0x168] ss:$16 sps:$4 sm:$0xff]  }
  0x48   :  { %1417 = vmatprep.subr.bf16.mxu0 %v2572_v34  ;;  %v2651_v34 = vld [vmem:[%s3673_s1 + $0x14c] ss:$16 sps:$4 sm:$0xff]  }
  0x4b   :  { %2332 = vmatmul.mubr.msk.bf16.vlgmr.msra.gmra.mxu1 %vm1327_vm0, %v3135_v38  ;;  %1418 = vmatpush1.bf16.msra.mxu0 %v2570_v37  ;;  %v2652_v37 = vld [vmem:[%s3673_s1 + $0x500] ss:$16 sps:$4 sm:$0xff]  }
  0x4c   :  { %1496 = vmatpush1.bf16.msra.mxu1 %v2567_v36  ;;  %1419 = vmatprep.subr.bf16.mxu0 %v2582_v39  ;;  %v112_v36 = vcombine.low %v3201_v61, %v3204_v62  ;;  %v2649_v39 = vld [vmem:[%s3673_s1 + $0x148] ss:$16 sps:$4 sm:$0xff]   ;;  %v2689_v62 = vld [vmem:[%s3673_s1 + $0x48c] ss:$16 sps:$4 sm:$0xff]  }
  0x4d   :  { %1497 = vmatprep.subr.bf16.mxu1 %v2579_v40  ;;  %1527 = vmatprep.mubr.bf16.mxu1 %v3057_v7  ;;  %v2615_v7 = vld [vmem:[%s3673_s1 + $0xc] ss:$16 sps:$4 sm:$0xff]   ;;  %v2681_v61 = vld [vmem:[%s3673_s1 + $0x4a8] ss:$16 sps:$4 sm:$0xff]  }
  0x4e   :  { %v2662_v40 = vld [vmem:[%s3673_s1 + $0x2ec] ss:$16 sps:$4 sm:$0xff]  }
  0x4f   :  { %1420 = vmatpush1.bf16.msra.mxu0 %v2580_v42  ;;  %v3321_v42 = vpack.c.bf16 %v112_v36, %v112_v36  ;;  %v2746_v36 = vld [vmem:[%s3673_s1 + $0x32c] ss:$16 sps:$4 sm:$0xff]  }
  0x50   :  { %1498 = vmatpush1.bf16.msra.mxu1 %v2577_v41  ;;  %1421 = vmatprep.subr.bf16.mxu0 %v2588_v43  ;;  %v2659_v41 = vld [vmem:[%s3673_s1 + $0x12c] ss:$16 sps:$4 sm:$0xff]   ;;  %v2660_v43 = vld [vmem:[%s3673_s1 + $0x2e8] ss:$16 sps:$4 sm:$0xff]  }
  0x51   :  { %1499 = vmatprep.subr.bf16.mxu1 %v2585_v44  ;;  %v2657_v44 = vld [vmem:[%s3673_s1 + $0x128] ss:$16 sps:$4 sm:$0xff]  }
  0x53   :  { %1422 = vmatpush1.bf16.msra.mxu0 %v2586_v47  ;;  %v2665_v47 = vld [vmem:[%s3673_s1 + $0x10c] ss:$16 sps:$4 sm:$0xff]  }
  0x54   :  { %1500 = vmatpush1.bf16.msra.mxu1 %v2583_v45  ;;  %1423 = vmatprep.subr.bf16.mxu0 %v2594_v48  ;;  %v2668_v45 = vld [vmem:[%s3673_s1 + $0x2cc] ss:$16 sps:$4 sm:$0xff]   ;;  %v2666_v48 = vld [vmem:[%s3673_s1 + $0x2c8] ss:$16 sps:$4 sm:$0xff]  }
  0x55   :  { %1501 = vmatprep.subr.bf16.mxu1 %v2591_v49  ;;  %v2663_v49 = vld [vmem:[%s3673_s1 + $0x108] ss:$16 sps:$4 sm:$0xff]  }
  0x57   :  { %1424 = vmatpush1.bf16.msra.mxu0 %v2592_v51  ;;  %v2671_v51 = vld [vmem:[%s3673_s1 + $0x4ec] ss:$16 sps:$4 sm:$0xff]  }
  0x58   :  { %1502 = vmatpush1.bf16.msra.mxu1 %v2589_v50  ;;  %1425 = vmatprep.subr.bf16.mxu0 %v2600_v53  ;;  %v2674_v50 = vld [vmem:[%s3673_s1 + $0x2ac] ss:$16 sps:$4 sm:$0xff]   ;;  %v2669_v53 = vld [vmem:[%s3673_s1 + $0x4e8] ss:$16 sps:$4 sm:$0xff]  }
  0x59   :  { %1503 = vmatprep.subr.bf16.mxu1 %v2597_v54  ;;  %v2677_v54 = vld [vmem:[%s3673_s1 + $0x4cc] ss:$16 sps:$4 sm:$0xff]  }
  0x5b   :  { %1426 = vmatpush1.bf16.msra.mxu0 %v2598_v56  ;;  %v2678_v56 = vld [vmem:[%s3673_s1 + $0x288] ss:$16 sps:$4 sm:$0xff]  }
  0x5c   :  { %1504 = vmatpush1.bf16.msra.mxu1 %v2595_v55  ;;  %1427 = vmatprep.subr.bf16.mxu0 %v2606_v57  ;;  %v2680_v55 = vld [vmem:[%s3673_s1 + $0x28c] ss:$16 sps:$4 sm:$0xff]   ;;  %v2675_v57 = vld [vmem:[%s3673_s1 + $0x4c8] ss:$16 sps:$4 sm:$0xff]  }
  0x5d   :  { %1505 = vmatprep.subr.bf16.mxu1 %v2603_v60  ;;  %v2684_v60 = vld [vmem:[%s3673_s1 + $0x268] ss:$16 sps:$4 sm:$0xff]  }
  0x5f   :  { %1428 = vmatpush1.bf16.msra.mxu0 %v2604_v63  ;;  %v2690_v63 = vld [vmem:[%s3673_s1 + $0x248] ss:$16 sps:$4 sm:$0xff]  }
  0x60   :  { %1506 = vmatpush1.bf16.msra.mxu1 %v2601_v0  ;;  %1429 = vmatprep.subr.bf16.mxu0 %v2612_v1  ;;  %v2687_v0 = vld [vmem:[%s3673_s1 + $0x488] ss:$16 sps:$4 sm:$0xff]   ;;  %v2695_v1 = vld [vmem:[%s3673_s1 + $0x46c] ss:$16 sps:$4 sm:$0xff]  }
  0x61   :  { %1507 = vmatprep.subr.bf16.mxu1 %v2609_v52  ;;  %v2696_v52 = vld [vmem:[%s3673_s1 + $0x228] ss:$16 sps:$4 sm:$0xff]  }
  0x63   :  { %1430 = vmatpush2.bf16.msra.mxu0 %v2610_v4  ;;  %v2704_v4 = vld [vmem:[%s3673_s1 + $0x20c] ss:$16 sps:$4 sm:$0xff]  }
  0x64   :  { %1508 = vmatpush1.bf16.msra.mxu1 %v2607_v5  ;;  %1431 = vmatprep.subr.bf16.mxu0 %v2618_v6  ;;  %v2701_v5 = vld [vmem:[%s3673_s1 + $0x44c] ss:$16 sps:$4 sm:$0xff]   ;;  %v2702_v6 = vld [vmem:[%s3673_s1 + $0x208] ss:$16 sps:$4 sm:$0xff]  }
  0x65   :  { %1509 = vmatprep.subr.bf16.mxu1 %v2615_v7  ;;  %v2699_v7 = vld [vmem:[%s3673_s1 + $0x448] ss:$16 sps:$4 sm:$0xff]  }
  0x67   :  { %1432 = vmatpush2.bf16.msra.mxu0 %v2616_v8  ;;  %v2710_v8 = vld [vmem:[%s3673_s1 + $0x3ec] ss:$16 sps:$4 sm:$0xff]  }
  0x68   :  { %1510 = vmatpush1.bf16.msra.mxu1 %v2613_v10  ;;  %1433 = vmatprep.subr.bf16.mxu0 %v2624_v11  ;;  %v2707_v10 = vld [vmem:[%s3673_s1 + $0x42c] ss:$16 sps:$4 sm:$0xff]   ;;  %v2708_v11 = vld [vmem:[%s3673_s1 + $0x3e8] ss:$16 sps:$4 sm:$0xff]  }
  0x69   :  { %1511 = vmatprep.subr.bf16.mxu1 %v2621_v12  ;;  %v2705_v12 = vld [vmem:[%s3673_s1 + $0x428] ss:$16 sps:$4 sm:$0xff]  }
  0x6b   :  { %1434 = vmatpush2.bf16.msra.mxu0 %v2622_v13  ;;  %v2716_v13 = vld [vmem:[%s3673_s1 + $0x3cc] ss:$16 sps:$4 sm:$0xff]  }
  0x6c   :  { %1512 = vmatpush2.bf16.msra.mxu1 %v2619_v14  ;;  %1435 = vmatprep.subr.bf16.mxu0 %v2630_v15  ;;  %v2713_v14 = vld [vmem:[%s3673_s1 + $0x40c] ss:$16 sps:$4 sm:$0xff]   ;;  %v2714_v15 = vld [vmem:[%s3673_s1 + $0x3c8] ss:$16 sps:$4 sm:$0xff]  }
  0x6d   :  { %1513 = vmatprep.subr.bf16.mxu1 %v2627_v16  ;;  %v2711_v16 = vld [vmem:[%s3673_s1 + $0x408] ss:$16 sps:$4 sm:$0xff]  }
  0x6f   :  { %1436 = vmatpush2.bf16.msra.mxu0 %v2628_v17  ;;  %v2722_v17 = vld [vmem:[%s3673_s1 + $0x3ac] ss:$16 sps:$4 sm:$0xff]  }
  0x70   :  { %1514 = vmatpush2.bf16.msra.mxu1 %v2625_v18  ;;  %1437 = vmatprep.subr.bf16.mxu0 %v2636_v19  ;;  %v2719_v18 = vld [vmem:[%s3673_s1 + $0x5ec] ss:$16 sps:$4 sm:$0xff]   ;;  %v2720_v19 = vld [vmem:[%s3673_s1 + $0x3a8] ss:$16 sps:$4 sm:$0xff]  }
  0x71   :  { %1515 = vmatprep.subr.bf16.mxu1 %v2633_v20  ;;  %v2717_v20 = vld [vmem:[%s3673_s1 + $0x5e8] ss:$16 sps:$4 sm:$0xff]  }
  0x73   :  { %1438 = vmatpush2.bf16.msra.mxu0 %v2634_v21  ;;  %v2728_v21 = vld [vmem:[%s3673_s1 + $0x38c] ss:$16 sps:$4 sm:$0xff]  }
  0x74   :  { %1516 = vmatpush2.bf16.msra.mxu1 %v2631_v22  ;;  %1439 = vmatprep.subr.bf16.mxu0 %v2642_v23  ;;  %v2725_v22 = vld [vmem:[%s3673_s1 + $0x5cc] ss:$16 sps:$4 sm:$0xff]   ;;  %v2726_v23 = vld [vmem:[%s3673_s1 + $0x388] ss:$16 sps:$4 sm:$0xff]  }
  0x75   :  { %1517 = vmatprep.subr.bf16.mxu1 %v2639_v25  ;;  %v2723_v25 = vld [vmem:[%s3673_s1 + $0x5c8] ss:$16 sps:$4 sm:$0xff]  }
  0x77   :  { %1440 = vmatpush2.bf16.msra.mxu0 %v2640_v27  ;;  %v2734_v27 = vld [vmem:[%s3673_s1 + $0x36c] ss:$16 sps:$4 sm:$0xff]  }
  0x78   :  { %1518 = vmatpush2.bf16.msra.mxu1 %v2637_v28  ;;  %1441 = vmatprep.subr.bf16.mxu0 %v2648_v29  ;;  %v2731_v28 = vld [vmem:[%s3673_s1 + $0x5ac] ss:$16 sps:$4 sm:$0xff]   ;;  %v2732_v29 = vld [vmem:[%s3673_s1 + $0x368] ss:$16 sps:$4 sm:$0xff]  }
  0x79   :  { %1519 = vmatprep.subr.bf16.mxu1 %v2645_v30  ;;  %v2729_v30 = vld [vmem:[%s3673_s1 + $0x5a8] ss:$16 sps:$4 sm:$0xff]  }
  0x7b   :  { %1442 = vmatpush2.bf16.msra.mxu0 %v2646_v31  ;;  %v2740_v31 = vld [vmem:[%s3673_s1 + $0x34c] ss:$16 sps:$4 sm:$0xff]  }
  0x7c   :  { %1520 = vmatpush2.bf16.msra.mxu1 %v2643_v32  ;;  %1443 = vmatprep.subr.bf16.mxu0 %v2654_v33  ;;  %v2737_v32 = vld [vmem:[%s3673_s1 + $0x58c] ss:$16 sps:$4 sm:$0xff]   ;;  %v2738_v33 = vld [vmem:[%s3673_s1 + $0x348] ss:$16 sps:$4 sm:$0xff]  }
  0x7d   :  { %1521 = vmatprep.subr.bf16.mxu1 %v2651_v34  ;;  %v2735_v34 = vld [vmem:[%s3673_s1 + $0x588] ss:$16 sps:$4 sm:$0xff]  }
  0x7f   :  { %1444 = vmatpush2.bf16.msra.mxu0 %v2652_v37  ;;  %v2743_v37 = vld [vmem:[%s3673_s1 + $0x56c] ss:$16 sps:$4 sm:$0xff]  }
  0x80   :  { %1522 = vmatpush2.bf16.msra.mxu1 %v2649_v39  ;;  %1536 = vmatprep.subr.bf16.mxu0 %v2662_v40  ;;  %v2744_v39 = vld [vmem:[%s3673_s1 + $0x328] ss:$16 sps:$4 sm:$0xff]  }
  0x81   :  { %1523 = vmatprep.subr.bf16.mxu1 %v2659_v41  ;;  %v2741_v40 = vld [vmem:[%s3673_s1 + $0x568] ss:$16 sps:$4 sm:$0xff]   ;;  %v2752_v41 = vld [vmem:[%s3673_s1 + $0x30c] ss:$16 sps:$4 sm:$0xff]  }
  0x82   :  { %1446 = vmatmul.mubr.bf16.vlgmr.msra.gmra.mxu0 %v3321_v42 }
  0x83   :  { %1537 = vmatpush1.bf16.msra.mxu0 %v2660_v43  ;;  %1568 = vmatprep.mubr.bf16.mxu0 %v3062_v9  ;;  %v2672_v9 = vld [vmem:[%s3673_s1 + $0x2a8] ss:$16 sps:$4 sm:$0xff]   ;;  %v2749_v43 = vld [vmem:[%s3673_s1 + $0x54c] ss:$16 sps:$4 sm:$0xff]  }
  0x84   :  { %1524 = vmatpush2.bf16.msra.mxu1 %v2657_v44  ;;  %1538 = vmatprep.subr.bf16.mxu0 %v2668_v45  ;;  %v2750_v44 = vld [vmem:[%s3673_s1 + $0x308] ss:$16 sps:$4 sm:$0xff]  }
  0x85   :  { %1525 = vmatprep.subr.bf16.mxu1 %v2665_v47  ;;  %v2747_v45 = vld [vmem:[%s3673_s1 + $0x548] ss:$16 sps:$4 sm:$0xff]  }
  0x86   :  { %v2762_v47 = vld [vmem:[%s3675_s3 + $0x78] sm:$0xff]  }
  0x87   :  { %1539 = vmatpush1.bf16.msra.mxu0 %v2666_v48  ;;  %v2755_v48 = vld [vmem:[%s3673_s1 + $0x52c] ss:$16 sps:$4 sm:$0xff]  }
  0x88   :  { %1526 = vmatpush2.bf16.msra.mxu1 %v2663_v49  ;;  %1540 = vmatprep.subr.bf16.mxu0 %v2674_v50  ;;  %v2763_v49 = vld [vmem:[%s3675_s3 + $0x38] sm:$0xff]  }
  0x89   :  { %1577 = vmatprep.subr.bf16.mxu1 %v2671_v51  ;;  %v2753_v50 = vld [vmem:[%s3673_s1 + $0x528] ss:$16 sps:$4 sm:$0xff]   ;;  %v2764_v51 = vld [vmem:[%s3675_s3 + $0x70] sm:$0xff]  }
  0x8b   :  { %1528 = vmatmul.mubr.bf16.vlgmr.msra.gmra.mxu1 %v3102_v24  ;;  %1541 = vmatpush1.bf16.msra.mxu0 %v2672_v9  ;;  %v2692_v24 = vld [vmem:[%s3673_s1 + $0x24c] ss:$16 sps:$4 sm:$0xff]   ;;  %v2765_v9 = vld [vmem:[%s3675_s3 + $0x30] sm:$0xff]  }
  0x8c   :  { %1578 = vmatpush1.bf16.msra.mxu1 %v2669_v53  ;;  %1542 = vmatprep.subr.bf16.mxu0 %v2680_v55  ;;  %v2758_v53 = vld [vmem:[%s3673_s1 + $0x50c] ss:$16 sps:$4 sm:$0xff]  }
  0x8d   :  { %1579 = vmatprep.subr.bf16.mxu1 %v2677_v54  ;;  %1609 = vmatprep.mubr.bf16.mxu1 %v3220_v3  ;;  %v2693_v3 = vld [vmem:[%s3673_s1 + $0x468] ss:$16 sps:$4 sm:$0xff]  }
  0x8e   :  { %v2756_v54 = vld [vmem:[%s3673_s1 + $0x508] ss:$16 sps:$4 sm:$0xff]  }
  0x8f   :  { %1543 = vmatpush1.bf16.msra.mxu0 %v2678_v56  ;;  %v2766_v55 = vld [vmem:[%s3675_s3 + $0x68] sm:$0xff]  }
  0x90   :  { %1580 = vmatpush1.bf16.msra.mxu1 %v2675_v57  ;;  %1544 = vmatprep.subr.bf16.mxu0 %v2686_v58  ;;  %v2767_v56 = vld [vmem:[%s3675_s3 + $0x28] sm:$0xff]   ;;  %v2768_v58 = vld [vmem:[%s3675_s3 + $0x60] sm:$0xff]  }
  0x91   :  { %1581 = vmatprep.subr.bf16.mxu1 %v2683_v59  ;;  %v2759_v57 = vld [vmem:[%s3673_s1 + $0x608] ss:$16 sps:$4 sm:$0xff]   ;;  %v2769_v59 = vld [vmem:[%s3675_s3 + $0x20] sm:$0xff]  }
  0x93   :  { %1545 = vmatpush1.bf16.msra.mxu0 %v2684_v60  ;;  %v2770_v60 = vld [vmem:[%s3675_s3 + $0x58] sm:$0xff]  }
  0x94   :  { %1582 = vmatpush1.bf16.msra.mxu1 %v2681_v61  ;;  %1546 = vmatprep.subr.bf16.mxu0 %v2692_v24  ;;  %v2771_v61 = vld [vmem:[%s3675_s3 + $0x18] sm:$0xff]  }
  0x95   :  { %1583 = vmatprep.subr.bf16.mxu1 %v2689_v62  ;;  %v2778_v24 = vld [vmem:[%s3675_s3 + $0xf8] sm:$0xff]   ;;  %v2780_v62 = vld [vmem:[%s3675_s3 + $0xf0] sm:$0xff]  }
  0x97   :  { %1547 = vmatpush1.bf16.msra.mxu0 %v2690_v63  ;;  %v2773_v63 = vld [vmem:[%s3675_s3 + $0x10] sm:$0xff]  }
  0x98   :  { %1584 = vmatpush1.bf16.msra.mxu1 %v2687_v0  ;;  %1548 = vmatprep.subr.bf16.mxu0 %v2698_v2  ;;  %v2774_v0 = vld [vmem:[%s3675_s3 + $0x48] sm:$0xff]  }
  0x99   :  { %1585 = vmatprep.subr.bf16.mxu1 %v2695_v1  ;;  %v2781_v1 = vld [vmem:[%s3675_s3 + $0xb0] sm:$0xff]   ;;  %v2775_v2 = vld [vmem:[%s3675_s3 + $0x8] sm:$0xff]  }
  0x9b   :  { %1549 = vmatpush1.bf16.msra.mxu0 %v2696_v52  ;;  %v2776_v52 = vld [vmem:[%s3675_s3 + $0x40] sm:$0xff]  }
  0x9c   :  { %1586 = vmatpush1.bf16.msra.mxu1 %v2693_v3  ;;  %1550 = vmatprep.subr.bf16.mxu0 %v2704_v4  ;;  %v2777_v3 = vld [vmem:[%s3675_s3] sm:$0xff]  }
  0x9d   :  { %1587 = vmatprep.subr.bf16.mxu1 %v2701_v5  ;;  %v2783_v5 = vld [vmem:[%s3675_s3 + $0xa8] sm:$0xff]  }
  0x9f   :  { %1551 = vmatpush1.bf16.msra.mxu0 %v2702_v6 }
  0xa0   :  { %1588 = vmatpush1.bf16.msra.mxu1 %v2699_v7  ;;  %1552 = vmatprep.subr.bf16.mxu0 %v2710_v8 }
  0xa1   :  { %1589 = vmatprep.subr.bf16.mxu1 %v2707_v10  ;;  %v2784_v10 = vld [vmem:[%s3675_s3 + $0xe0] sm:$0xff]  }
  0xa3   :  { %1553 = vmatpush2.bf16.msra.mxu0 %v2708_v11  ;;  %v2785_v11 = vld [vmem:[%s3675_s3 + $0xa0] sm:$0xff]  }
  0xa4   :  { %1590 = vmatpush1.bf16.msra.mxu1 %v2705_v12  ;;  %1554 = vmatprep.subr.bf16.mxu0 %v2716_v13 }
  0xa5   :  { %1591 = vmatprep.subr.bf16.mxu1 %v2713_v14 }
  0xa7   :  { %1555 = vmatpush2.bf16.msra.mxu0 %v2714_v15 }
  0xa8   :  { %1592 = vmatpush1.bf16.msra.mxu1 %v2711_v16  ;;  %1556 = vmatprep.subr.bf16.mxu0 %v2722_v17  ;;  %v2786_v16 = vld [vmem:[%s3675_s3 + $0xd8] sm:$0xff]  }
  0xa9   :  { %1593 = vmatprep.subr.bf16.mxu1 %v2719_v18  ;;  %v2787_v17 = vld [vmem:[%s3675_s3 + $0x98] sm:$0xff]  }
  0xab   :  { %1557 = vmatpush2.bf16.msra.mxu0 %v2720_v19 }
  0xac   :  { %1594 = vmatpush2.bf16.msra.mxu1 %v2717_v20  ;;  %1558 = vmatprep.subr.bf16.mxu0 %v2728_v21  ;;  %v2788_v20 = vld [vmem:[%s3675_s3 + $0xd0] sm:$0xff]  }
  0xad   :  { %1595 = vmatprep.subr.bf16.mxu1 %v2725_v22  ;;  %v2789_v21 = vld [vmem:[%s3675_s3 + $0x90] sm:$0xff]  }
  0xaf   :  { %1559 = vmatpush2.bf16.msra.mxu0 %v2726_v23 }
  0xb0   :  { %1596 = vmatpush2.bf16.msra.mxu1 %v2723_v25  ;;  %1560 = vmatprep.subr.bf16.mxu0 %v2734_v27  ;;  %v2790_v25 = vld [vmem:[%s3675_s3 + $0xc8] sm:$0xff]  }
  0xb1   :  { %1597 = vmatprep.subr.bf16.mxu1 %v2731_v28  ;;  %v2791_v27 = vld [vmem:[%s3675_s3 + $0x88] sm:$0xff]   ;;  %v2792_v28 = vld [vmem:[%s3675_s3 + $0xc0] sm:$0xff]  }
  0xb3   :  { %1561 = vmatpush2.bf16.msra.mxu0 %v2732_v29  ;;  %v2793_v29 = vld [vmem:[%s3675_s3 + $0x80] sm:$0xff]  }
  0xb4   :  { %1598 = vmatpush2.bf16.msra.mxu1 %v2729_v30  ;;  %1562 = vmatprep.subr.bf16.mxu0 %v2740_v31  ;;  %v329_v30 = vsub.s32 0, %v2997_v46  ;;  %v325_v31 = vld [vmem:[%s3674_s2] sm:$0xf] }
  0xb5   :  { %1599 = vmatprep.subr.bf16.mxu1 %v2737_v32  ;;  %v333_v32 = vsub.s32 1, %v2997_v46 }
  0xb7   :  { %1563 = vmatpush2.bf16.msra.mxu0 %v2738_v33  ;;  %v330_v33 = vrot.slane %v325_v31, %v329_v30 }
  0xb8   :  { %1600 = vmatpush2.bf16.msra.mxu1 %v2735_v34  ;;  %1564 = vmatprep.subr.bf16.mxu0 %v2746_v36  ;;  %v334_v34 = vrot.slane %v325_v31, %v333_v32 }
  0xb9   :  { %1601 = vmatprep.subr.bf16.mxu1 %v2743_v37 }
  0xbb   :  { %1565 = vmatpush2.bf16.msra.mxu0 %v2744_v39 }
  0xbc   :  { %1602 = vmatpush2.bf16.msra.mxu1 %v2741_v40  ;;  %1566 = vmatprep.subr.bf16.mxu0 %v2752_v41 }
  0xbd   :  { %1603 = vmatprep.subr.bf16.mxu1 %v2749_v43 }
  0xbf   :  { %1567 = vmatpush2.bf16.msra.mxu0 %v2750_v44 }
  0xc0   :  { %1604 = vmatpush2.bf16.msra.mxu1 %v2747_v45  ;;  %2376 = vmatprep.subr.bf16.mxu0 %v2762_v47 }
  0xc1   :  { %1605 = vmatprep.subr.bf16.mxu1 %v2755_v48 }
  0xc2   :  { %1569 = vmatmul.mubr.bf16.vlgmr.msra.gmra.mxu0 %v3107_v26  ;;  %v2761_v26 = vld [vmem:[%s3673_s1 + $0x60c] ss:$16 sps:$4 sm:$0xff]  }
  0xc3   :  { %2377 = vmatpush3.bf16.msra.mxu0 %v2763_v49 }
  0xc4   :  { %1606 = vmatpush2.bf16.msra.mxu1 %v2753_v50  ;;  %2378 = vmatprep.subr.bf16.mxu0 %v2764_v51 }
  0xc5   :  { %1607 = vmatprep.subr.bf16.mxu1 %v2758_v53 }
  0xc7   :  { %2379 = vmatpush3.bf16.msra.mxu0 %v2765_v9 }
  0xc8   :  { %1608 = vmatpush2.bf16.msra.mxu1 %v2756_v54  ;;  %2380 = vmatprep.subr.bf16.mxu0 %v2766_v55 }
  0xc9   :  { %1632 = vmatprep.subr.bf16.mxu1 %v2761_v26 }
  0xcb   :  { %1610 = vmatmul.mubr.bf16.vlgmr.msra.gmra.mxu1 %v3321_v42  ;;  %2381 = vmatpush3.bf16.msra.mxu0 %v2767_v56  ;;  %v2772_v42 = vld [vmem:[%s3675_s3 + $0x50] sm:$0xff]  }
  0xcc   :  { %1633 = vmatpush1.bf16.msra.mxu1 %v2759_v57  ;;  %1650 = vmatprep.mubr.bf16.mxu1 %v2825_v35  ;;  %v2779_v35 = vld [vmem:[%s3675_s3 + $0xb8] sm:$0xff]  }
  0xcd   :  { %2382 = vmatprep.subr.bf16.mxu0 %v2768_v58  ;;  %2398 = vmatprep.subr.bf16.mxu1 %v2778_v24 }
  0xcf   :  { %2383 = vmatpush3.bf16.msra.mxu0 %v2769_v59  ;;  %v337_v59 = vsub.s32 2, %v2997_v46 }
  0xd0   :  { %2384 = vmatprep.subr.bf16.mxu0 %v2770_v60  ;;  %v341_v60 = vsub.s32 3, %v2997_v46 }
  0xd3   :  { %2333 = vmatmul.mubr.msk.bf16.vlgmr.msra.gmra.mxu1 %vm1327_vm0, %v3135_v38  ;;  %2385 = vmatpush3.bf16.msra.mxu0 %v2771_v61  ;;  %v2782_v38 = vld [vmem:[%s3675_s3 + $0xe8] sm:$0xff]  }
  0xd4   :  { %2386 = vmatprep.subr.bf16.mxu0 %v2772_v42  ;;  %2399 = vmatpush3.bf16.msra.mxu1 %v2779_v35  ;;  %v338_v42 = vrot.slane %v325_v31, %v337_v59  ;;  %v342_v35 = vrot.slane %v325_v31, %v341_v60 }
  0xd5   :  { %2400 = vmatprep.subr.bf16.mxu1 %v2780_v62 }
  0xd7   :  { %2387 = vmatpush3.bf16.msra.mxu0 %v2773_v63 }
  0xd8   :  { %2388 = vmatprep.subr.bf16.mxu0 %v2774_v0  ;;  %2401 = vmatpush3.bf16.msra.mxu1 %v2781_v1 }
  0xd9   :  { %2402 = vmatprep.subr.bf16.mxu1 %v2782_v38 }
  0xdb   :  { %2389 = vmatpush3.bf16.msra.mxu0 %v2775_v2 }
  0xdc   :  { %2390 = vmatprep.subr.bf16.mxu0 %v2776_v52  ;;  %2403 = vmatpush3.bf16.msra.mxu1 %v2783_v5 }
  0xdd   :  { %2404 = vmatprep.subr.bf16.mxu1 %v2784_v10 }
  0xdf   :  { %2391 = vmatpush3.bf16.msra.mxu0 %v2777_v3  ;;  %v2794_v3 = vld [vmem:[%s3677_s5 + $0x38] sm:$0xff]  }
  0xe0   :  { %2405 = vmatpush3.bf16.msra.mxu1 %v2785_v11 }
  0xe1   :  { %2406 = vmatprep.subr.bf16.mxu1 %v2786_v16 }
  0xe4   :  { %2407 = vmatpush3.bf16.msra.mxu1 %v2787_v17  ;;  %v2797_v17 = vld [vmem:[%s3677_s5 + $0x20] sm:$0xff]  }
  0xe5   :  { %2408 = vmatprep.subr.bf16.mxu1 %v2788_v20  ;;  %v2800_v20 = vld [vmem:[%s3677_s5 + $0x8] sm:$0xff]  }
  0xe8   :  { %2409 = vmatpush3.bf16.msra.mxu1 %v2789_v21  ;;  %v2801_v21 = vld [vmem:[%s3677_s5] sm:$0xff]  }
  0xe9   :  { %2410 = vmatprep.subr.bf16.mxu1 %v2790_v25 }
  0xec   :  { %2411 = vmatpush3.bf16.msra.mxu1 %v2791_v27 }
  0xed   :  { %2412 = vmatprep.subr.bf16.mxu1 %v2792_v28 }
  0xf0   :  { %2413 = vmatpush3.bf16.msra.mxu1 %v2793_v29  ;;  %v2334_v29 = vld [vmem:[%s3676_s4] ss:$0 sm:$0xff] }
 0x102   :  { %v1365_v4 = vpop.f32.mrf.mxu0 }
 0x103   :  { %v1406_v6 = vpop.f32.mrf.mxu1  ;;  %v1366_v36 = vadd.f32 %v1365_v4, %v330_v33 }
 0x104   :  { %v1367_v7 = vpop.f32.mrf.mxu0 }
 0x105   :  { %v1408_v8 = vpop.f32.mrf.mxu1  ;;  %v1368_v37 = vadd.f32 %v1367_v7, %v334_v34  ;;  %v1407_v39 = vadd.f32 %v1406_v6, %v1366_v36  ;;  %v2826_v6 = vmov 0.0   ;;  %v2795_v7 = vld [vmem:[%s3677_s5 + $0x30] sm:$0xff]  }
 0x106   :  { %v1369_v12 = vpop.f32.mrf.mxu0  ;;  %2429 = vmatprep.subr.bf16.mxu0 %v2826_v6 }
 0x107   :  { %v1410_v13 = vpop.f32.mrf.mxu1  ;;  %v1409_v41 = vadd.f32 %v1408_v8, %v1368_v37 }
 0x108   :  { %v1370_v14 = vpop.f32.mrf.mxu0 }
 0x109   :  { %v1411_v15 = vpop.f32.mrf.mxu1  ;;  %v2796_v14 = vld [vmem:[%s3677_s5 + $0x28] sm:$0xff]  }
 0x10b   :  { %v1488_v18 = vpop.f32.mrf.mxu1 }
 0x10d   :  { %v1490_v19 = vpop.f32.mrf.mxu1 }
 0x10f   :  { %v1492_v22 = vpop.f32.mrf.mxu1 }
 0x111   :  { %v1493_v23 = vpop.f32.mrf.mxu1 }
 0x142   :  { %v1447_v40 = vpop.f32.mrf.mxu0 }
 0x143   :  { %v1448_v43 = vadd.f32 %v1447_v40, %v1407_v39  ;;  %v2367_v40 = vld [vmem:[%s3678_s6] ss:$0 sm:$0xff] }
 0x144   :  { %v1449_v44 = vpop.f32.mrf.mxu0 }
 0x145   :  { %v1450_v45 = vadd.f32 %v1449_v44, %v1409_v41  ;;  %v1489_v47 = vadd.f32 %v1488_v18, %v1448_v43  ;;  %v2798_v18 = vld [vmem:[%s3677_s5 + $0x18] sm:$0xff]  }
 0x146   :  { %v1451_v48 = vpop.f32.mrf.mxu0 }
 0x147   :  { %v1491_v49 = vadd.f32 %v1490_v19, %v1450_v45  ;;  %v1659_v53 = vpack.c.bf16 %v1489_v47, %v1489_v47  ;;  %v2799_v19 = vld [vmem:[%s3677_s5 + $0x10] sm:$0xff]  }
 0x148   :  { %v1452_v50 = vpop.f32.mrf.mxu0 }
 0x149   :  { %v1660_v51 = vpack.c.bf16 %v1491_v49, %v1491_v49 }
 0x14b   :  { %v1529_v9 = vpop.f32.mrf.mxu1  ;;  %1958 = vmatprep.mubr.bf16.mxu0 %v1660_v51 }
 0x14c   :  { %1959 = vmatmul.mubr.bf16.vlgmr.msra.gmra.mxu0 %v1659_v53  ;;  %v1530_v63 = vadd.f32 %v1529_v9, %v338_v42 }
 0x14d   :  { %v1531_v54 = vpop.f32.mrf.mxu1  ;;  %2430 = vmatpush3.bf16.msra.mxu0 %v2794_v3  ;;  %2445 = vmatprep.mubr.msk.bf16.mxu0 %vm2827_vm1, %v2826_v6 }
 0x14e   :  { %v1532_v1 = vadd.f32 %v1531_v54, %v342_v35  ;;  %2431 = vmatprep.subr.bf16.mxu0 %v2826_v6 }
 0x14f   :  { %v1533_v55 = vpop.f32.mrf.mxu1 }
 0x151   :  { %v1534_v26 = vpop.f32.mrf.mxu1  ;;  %2432 = vmatpush3.bf16.msra.mxu0 %v2795_v7 }
 0x152   :  { %2433 = vmatprep.subr.bf16.mxu0 %v2826_v6 }
 0x155   :  { %2434 = vmatpush3.bf16.msra.mxu0 %v2796_v14 }
 0x156   :  { %2435 = vmatprep.subr.bf16.mxu0 %v2826_v6 }
 0x159   :  { %2436 = vmatpush3.bf16.msra.mxu0 %v2797_v17 }
 0x15a   :  { %2437 = vmatprep.subr.bf16.mxu0 %v2826_v6 }
 0x15d   :  { %2438 = vmatpush3.bf16.msra.mxu0 %v2798_v18 }
 0x15e   :  { %2439 = vmatprep.subr.bf16.mxu0 %v2826_v6 }
 0x161   :  { %2440 = vmatpush3.bf16.msra.mxu0 %v2799_v19 }
 0x162   :  { %2441 = vmatprep.subr.bf16.mxu0 %v2826_v6 }
 0x165   :  { %2442 = vmatpush3.bf16.msra.mxu0 %v2800_v20 }
 0x166   :  { %2443 = vmatprep.subr.bf16.mxu0 %v2826_v6 }
 0x169   :  { %2444 = vmatpush3.bf16.msra.mxu0 %v2801_v21 }
 0x182   :  { %v1570_v56 = vpop.f32.mrf.mxu0 }
 0x183   :  { %v1571_v38 = vadd.f32 %v1570_v56, %v1530_v63 }
 0x184   :  { %v1572_v57 = vpop.f32.mrf.mxu0 }
 0x185   :  { %v1573_v52 = vadd.f32 %v1572_v57, %v1532_v1 }
 0x186   :  { %v1574_v58 = vpop.f32.mrf.mxu0 }
 0x188   :  { %v1575_v61 = vpop.f32.mrf.mxu0 }
 0x18b   :  { %v1611_v24 = vpop.f32.mrf.mxu1 }
 0x18c   :  { %v1612_v4 = vadd.f32 %v1611_v24, %v1571_v38 }
 0x18d   :  { %v1613_v62 = vpop.f32.mrf.mxu1 }
 0x18e   :  { %v1614_v46 = vadd.f32 %v1613_v62, %v1573_v52 }
 0x18f   :  { %v1615_v0 = vpop.f32.mrf.mxu1 }
 0x191   :  { %v1616_v2 = vpop.f32.mrf.mxu1 }
 0x193   :  { %v1652_v5 = vpop.f32.mrf.mxu1 }
 0x194   :  { %v1653_v8 = vadd.f32 %v1652_v5, %v1612_v4 }
 0x195   :  { %v1654_v10 = vpop.f32.mrf.mxu1 }
 0x196   :  { %v1655_v11 = vadd.f32 %v1654_v10, %v1614_v46  ;;  %v1661_v15 = vpack.c.bf16 %v1653_v8, %v1653_v8 }
 0x197   :  { %v1656_v12 = vpop.f32.mrf.mxu1 }
 0x198   :  { %v1662_v13 = vpack.c.bf16 %v1655_v11, %v1655_v11 }
 0x199   :  { %v1657_v16 = vpop.f32.mrf.mxu1 }
 0x19a   :  { %1998 = vmatprep.mubr.bf16.mxu1 %v1662_v13 }
 0x19b   :  { %1999 = vmatmul.mubr.bf16.vlgmr.msra.gmra.mxu1 %v1661_v15 }
 0x20c   :  { %v2392_v22 = vpop.f32.mrf.mxu0 }
 0x20e   :  { %v2393_v23 = vpop.f32.mrf.mxu0 }
 0x20f   :  { %v2394_v25 = vadd.f32 %v2393_v23, %v2392_v22 }
 0x210   :  { %v2395_v27 = vpop.f32.mrf.mxu0 }
 0x211   :  { %v1961_v32 = vadd.f32 %v2394_v25, %v2334_v29 }
 0x212   :  { %v2396_v28 = vpop.f32.mrf.mxu0 }
 0x25b   :  { %v2414_v30 = vpop.f32.mrf.mxu1 }
 0x25d   :  { %v2415_v31 = vpop.f32.mrf.mxu1 }
 0x25e   :  { %v2416_v33 = vadd.f32 %v2415_v31, %v2414_v30 }
 0x25f   :  { %v2417_v34 = vpop.f32.mrf.mxu1 }
 0x260   :  { %v2001_v36 = vadd.f32 %v2416_v33, %v1961_v32 }
 0x261   :  { %v2418_v37 = vpop.f32.mrf.mxu1 }
 0x262   :  { %v2006_v39 = vpack.c.bf16 %v2001_v36, %v2001_v36 }
 0x264   :  { %2446 = vmatmul.mubr.bf16.vlgmr.msra.gmra.mxu0 %v2006_v39 }
 0x324   :  { %v2112_v41 = vpop.f32.mrf.mxu0 }
 0x325   :  { %v2113_v43 = vadd.f32 %v2367_v40, %v2112_v41 }
 0x326   :  { %v2447_v44 = vpop.f32.mrf.mxu0 }
 0x327   :  { %2119 = vst.msk [vmem:[#allocation2] sm:$0xff] %vm2118_vm2, %v2113_v43 }
 0x328   :  { %v2115_v45 = vpop.f32.mrf.mxu0 }
 0x32a   :  { %v2448_v47 = vpop.f32.mrf.mxu0 }
 0x32b   :  { %2124 = vsyncadd [#allocation3], 96  ;;  %s2828_s4 = smov [#allocation2]  }
 0x32c   :  { %s2125_s17 = sshll.u32 %s2828_s4, 4  ;;  %s2126_s17 = int_to_ptr.vmem [resolvable:$true] %s2125_s17 }
 0x32d   :  { %s2802_s18 = scalar_lea.vmem %s2126_s17, 32  ;;  %s2806_s19 = scalar_lea.vmem %s2126_s17, 128 }
 0x32e   :  { %p2803_p0 = scmp.ne.s32.totalorder %s2126_s17, %s2802_s18  ;;  %p2807_p1 = scmp.lt.s32.totalorder %s2126_s17, %s2126_s17 }
 0x32f   :  { %p2808_p2 = scmp.lt.s32.totalorder %s2806_s19, %s2802_s18 }
 0x331   :  { %p2809_p3 = por %p2808_p2, %p2807_p1 }
 0x333   :  { %p2810_p4 = pnand %p2809_p3, %p2803_p0 }
 0x335   :  { %2813 = shalt.err (!%p2810_p4)
}
 0x336   :  { %s2829_s6 = smov 32   ;;  %s2830_s20 = smov 2  }
 0x337   :  { %2131 = dma.vmem_to_hbm [thread:$0]  %s2126_s17, 32, %s3679_s7, [#allocation3], %s2829_s6, %s2829_s6, %s2830_s20  }
 0x338   :  { %2822 = dma.done.wait [#allocation3], 128  }
 0x339   :  { %2823 = vsyncadd [#allocation3], 4294967168 }
 0x33a   :  { %2135 = vsyncpa [#allocation3], 1 }

</bundles_post_ra>
